<compile_context>
chip_gen: v7x
topology: tpu7x:2x2x1
jax: 0.10.0
libtpu: 0.0.40
codegen_flags: <defaults>
</compile_context>

<pallas_src>
import functools

import jax
import jax.numpy as jnp
from jax.experimental import pallas as pl
from jax.experimental.pallas import tpu as pltpu


def _rup(n, m):
    return pl.cdiv(n, m) * m


def mlp_kernel(x_ref, *rest, actor, low_precision_elementwise):
    """One batch tile of the full 4-layer MLP.  Weights/biases are resident in VMEM."""
    *w_refs, b_ref, o_ref = rest
    cdt = w_refs[0].dtype                   # matmul operand dtype (bf16 or f32)
    n_layers = len(w_refs)

    h = x_ref[...]                          # (TB, in_pad), already in cdt
    for l, w_ref in enumerate(w_refs):
        width = w_ref.shape[1]              # static padded output width of this layer
        # MXU matmul; always accumulate in f32.
        y = jnp.dot(h, w_ref[...], preferred_element_type=jnp.float32)
        last = l == n_layers - 1
        if (not last) and low_precision_elementwise:
            # v6e/v7x fast path: bias add + ReLU in the matmul dtype (bf16-native VALUs).
            h = y.astype(cdt) + b_ref[l : l + 1, :width].astype(cdt)
            h = jnp.maximum(h, 0.0)
        else:
            h = y + b_ref[l : l + 1, :width]        # bias add in f32 (safe on v5e VPU)
            if not last:
                h = jnp.maximum(h, 0.0).astype(cdt)  # ReLU f32, cast once for next matmul
            elif actor:
                h = jnp.tanh(h)                      # Tanh in f32 (EUP); tanh(0)=0 in pads
    o_ref[...] = h.astype(o_ref.dtype)      # lane-dense (TB, out_pad) f32 store


def prepare_params(params, matmul_dtype=jnp.bfloat16):
    """Pad weights to lane-dense (multiples of 128) shapes and pack biases.

    Call ONCE outside the hot loop; `mlp_forward` then only pads x per call.
    params: list of 4 (W, b) tuples with W stored (in_features, out_features).
    """
    dims = [params[0][0].shape[0]] + [w.shape[1] for (w, _) in params]
    pdims = [_rup(d, 128) for d in dims]
    dmax = max(pdims[1:])

    ws = []
    b_packed = jnp.zeros((len(params), dmax), jnp.float32)
    for l, (w, b) in enumerate(params):
        wp = jnp.zeros((pdims[l], pdims[l + 1]), matmul_dtype)
        wp = wp.at[: w.shape[0], : w.shape[1]].set(w.astype(matmul_dtype))
        ws.append(wp)
        b_packed = b_packed.at[l, : b.shape[0]].set(b.astype(jnp.float32))

    meta = dict(state_dim=dims[0], out_dim=dims[-1], pdims=tuple(pdims), dmax=dmax)
    return tuple(ws), b_packed, meta


def mlp_forward(x, prepared, *, actor=True, block_batch=1024,
                low_precision_elementwise=False):
    """x: (batch, state_dim) f32.  prepared: output of prepare_params."""
    ws, b_packed, meta = prepared
    pdims, dmax = meta["pdims"], meta["dmax"]
    state_dim, out_dim = meta["state_dim"], meta["out_dim"]
    matmul_dtype = ws[0].dtype
    isz = jnp.dtype(matmul_dtype).itemsize
    n_layers = len(ws)
    batch = x.shape[0]

    # ---- batch tiling: balanced tiles (multiples of 8), grid >= 2 when worthwhile so
    #      both v7x TensorCores get work ("parallel" batch axis) ----
    b8 = _rup(batch, 8)
    num_tiles = pl.cdiv(b8, block_batch)
    if b8 >= 16 and num_tiles < 2:
        num_tiles = 2
    tb = _rup(pl.cdiv(b8, num_tiles), 8)

    # ---- explicit VMEM budget (v7x: 64 MiB physical): resident weights (single copy)
    #      + double-buffered x/out tiles + f32 intermediate activations ----
    w_bytes = sum(w.size * w.dtype.itemsize for w in ws) + b_packed.size * 4

    def act_bytes(t):
        return 2 * t * (pdims[0] * isz + pdims[-1] * 4) + 2 * t * dmax * 4

    budget = 48 * 1024 * 1024
    while tb > 8 and w_bytes + act_bytes(tb) > budget:
        tb = _rup(tb // 2, 8)
    assert w_bytes + act_bytes(tb) <= budget, "weights too large to stay resident in VMEM"
    # TODO(synk): stream weights via pltpu.emit_pipeline / tile the N dim when the resident
    # weights alone exceed ~48 MiB (very wide hidden dims on v7x).

    num_tiles = pl.cdiv(b8, tb)
    b_pad = num_tiles * tb

    # pad x once per call, directly in the matmul dtype (halves streamed bytes for bf16)
    x_p = jnp.zeros((b_pad, pdims[0]), matmul_dtype).at[:batch, :state_dim].set(
        x.astype(matmul_dtype))

    grid = (num_tiles,)
    # weights & packed biases: whole-array, single-buffered, resident in VMEM
    resident = pl.BlockSpec(memory_space=pltpu.MemorySpace.VMEM)
    in_specs = [pl.BlockSpec((tb, pdims[0]), lambda i: (i, 0))]
    in_specs += [resident] * n_layers
    in_specs.append(resident)
    out_specs = pl.BlockSpec((tb, pdims[-1]), lambda i: (i, 0))

    # ---- advisory cost estimate for XLA's scheduler (padded FLOPs; advisory only) ----
    flops = 2 * b_pad * sum(pdims[l] * pdims[l + 1] for l in range(n_layers))
    bytes_accessed = x_p.size * x_p.dtype.itemsize + w_bytes + b_pad * pdims[-1] * 4
    cost = pl.CostEstimate(
        flops=int(flops),
        transcendentals=int(b_pad * pdims[-1]) if actor else 0,
        bytes_accessed=int(bytes_accessed),
    )

    needed = w_bytes + act_bytes(tb)
    vmem_limit = int(min(64 * 1024 * 1024, max(32 * 1024 * 1024, 2 * needed)))

    out = pl.pallas_call(
        functools.partial(mlp_kernel, actor=actor,
                          low_precision_elementwise=low_precision_elementwise),
        out_shape=jax.ShapeDtypeStruct((b_pad, pdims[-1]), jnp.float32),
        grid=grid,
        in_specs=in_specs,
        out_specs=out_specs,
        compiler_params=pltpu.CompilerParams(
            dimension_semantics=("parallel",),   # batch axis shards across v7x's 2 TCs
            vmem_limit_bytes=vmem_limit,
        ),
        cost_estimate=cost,
    )(x_p, *ws, b_packed)

    # slice padded rows / lanes back to the logical shape
    return out[:batch, :out_dim]


def init_params(key, state_dim, hidden_dim, out_dim, actor=True):
    """PyTorch nn.Linear-style init: U(-1/sqrt(fan_in), 1/sqrt(fan_in)); W stored (in, out)."""
    dims = [
        (state_dim, hidden_dim),
        (hidden_dim, hidden_dim),
        (hidden_dim, hidden_dim),
        (hidden_dim, out_dim if actor else 1),
    ]
    params = []
    for fan_in, fan_out in dims:
        key, kw, kb = jax.random.split(key, 3)
        bound = 1.0 / jnp.sqrt(float(fan_in))
        w = jax.random.uniform(kw, (fan_in, fan_out), jnp.float32, -bound, bound)
        b = jax.random.uniform(kb, (fan_out,), jnp.float32, -bound, bound)
        params.append((w, b))
    return params


def reference_forward(x, params, *, actor=True):
    """Plain-JAX reference of the same math (f32)."""
    h = x
    for i, (w, b) in enumerate(params):
        h = h @ w + b
        if i < len(params) - 1:
            h = jnp.maximum(h, 0.0)
        elif actor:
            h = jnp.tanh(h)
    return h


if __name__ == "__main__":
    batch, state_dim, hidden_dim, out_dim = 8, 8, 32, 4

    key = jax.random.PRNGKey(0)
    key, kx = jax.random.split(key)
    x = jax.random.normal(kx, (batch, state_dim), jnp.float32)
    params = init_params(key, state_dim, hidden_dim, out_dim, actor=True)

    prep_f32 = prepare_params(params, jnp.float32)      # tight-accuracy path
    prep_bf16 = prepare_params(params)                   # default bf16 operands

    # 1) small-batch actor path, f32 operands, tight tolerance
    out = jax.block_until_ready(mlp_forward(x, prep_f32, actor=True))
    ref = reference_forward(x, params, actor=True)
    assert out.shape == (batch, out_dim)
    assert jnp.allclose(out, ref, atol=1e-5, rtol=1e-5), "f32 actor mismatch vs reference"

    # 2) larger, non-tile-divisible batch -> balanced 2-tile grid (152 rows each), f32
    xb = jax.random.normal(jax.random.PRNGKey(1), (300, state_dim), jnp.float32)
    outb = jax.block_until_ready(mlp_forward(xb, prep_f32, actor=True))
    refb = reference_forward(xb, params, actor=True)
    assert outb.shape == (300, out_dim)
    assert jnp.allclose(outb, refb, atol=1e-5, rtol=1e-5), "tiled f32 mismatch vs reference"

    # 3) default bf16 matmul operands with f32 accumulation (coarse check vs f32 reference)
    outbf = jax.block_until_ready(mlp_forward(xb, prep_bf16, actor=True))
    assert float(jnp.max(jnp.abs(outbf - refb))) < 0.1, "bf16 path diverged too far"

    # 3b) bf16 element-wise variant (v6e/v7x option)
    outbf2 = jax.block_until_ready(
        mlp_forward(xb, prep_bf16, actor=True, low_precision_elementwise=True))
    assert float(jnp.max(jnp.abs(outbf2 - refb))) < 0.1, "bf16 elementwise path diverged"

    # 4) critic head (actor=False): final Linear -> 1, no tanh
    cparams = init_params(jax.random.PRNGKey(2), state_dim, hidden_dim, out_dim, actor=False)
    cprep = prepare_params(cparams, jnp.float32)
    outc = jax.block_until_ready(mlp_forward(x, cprep, actor=False))
    refc = reference_forward(x, cparams, actor=False)
    assert outc.shape == (batch, 1)
    assert jnp.allclose(outc, refc, atol=1e-5, rtol=1e-5), "critic mismatch vs reference"

    print("KERNEL_OK")
</pallas_src>

<mosaic_0001>
module attributes {stable_mosaic.version = 11 : i64} {
  func.func @mlp_kernel(%arg0: i32, %arg1: memref<8x128xf32, #tpu.memory_space<vmem>>, %arg2: memref<128x128xf32, #tpu.memory_space<vmem>>, %arg3: memref<128x128xf32, #tpu.memory_space<vmem>>, %arg4: memref<128x128xf32, #tpu.memory_space<vmem>>, %arg5: memref<128x128xf32, #tpu.memory_space<vmem>>, %arg6: memref<4x128xf32, #tpu.memory_space<vmem>>, %arg7: memref<8x128xf32, #tpu.memory_space<vmem>>) attributes {dimension_semantics = [#tpu.dimension_semantics<parallel>], iteration_bounds = array<i64: 1>, scalar_prefetch = 0 : i64, scratch_operands = 0 : i64, tpu.core_type = #tpu.core_type<tc>, window_params = [{transform_indices = @transform_0, window_bounds = array<i64: 8, 128>}, {pipeline_mode = #tpu.pipeline_mode<synchronous>, transform_indices = @transform_1, window_bounds = array<i64: 128, 128>}, {pipeline_mode = #tpu.pipeline_mode<synchronous>, transform_indices = @transform_2, window_bounds = array<i64: 128, 128>}, {pipeline_mode = #tpu.pipeline_mode<synchronous>, transform_indices = @transform_3, window_bounds = array<i64: 128, 128>}, {pipeline_mode = #tpu.pipeline_mode<synchronous>, transform_indices = @transform_4, window_bounds = array<i64: 128, 128>}, {pipeline_mode = #tpu.pipeline_mode<synchronous>, transform_indices = @transform_5, window_bounds = array<i64: 4, 128>}, {transform_indices = @transform_6, window_bounds = array<i64: 8, 128>}]} {
    %c0 = arith.constant 0 : index
    %c0_0 = arith.constant 0 : index
    %0 = vector.load %arg1[%c0, %c0_0] : memref<8x128xf32, #tpu.memory_space<vmem>>, vector<8x128xf32>
    %c0_1 = arith.constant 0 : index
    %c0_2 = arith.constant 0 : index
    %1 = vector.load %arg2[%c0_1, %c0_2] : memref<128x128xf32, #tpu.memory_space<vmem>>, vector<128x128xf32>
    %cst = arith.constant dense<0.000000e+00> : vector<8x128xf32>
    %2 = tpu.matmul %0, %1, %cst {dimension_numbers = #tpu.dot_dimension_numbers<[1], [0], [0], [1], [0, 0, 1, 1], [], []>} : vector<8x128xf32>, vector<128x128xf32>, vector<8x128xf32> -> vector<8x128xf32>
    %c0_3 = arith.constant 0 : index
    %c0_4 = arith.constant 0 : index
    %3 = vector.load %arg6[%c0_3, %c0_4] : memref<4x128xf32, #tpu.memory_space<vmem>>, vector<1x128xf32>
    %4 = vector.broadcast %3 : vector<1x128xf32> to vector<8x128xf32>
    %5 = arith.addf %2, %4 : vector<8x128xf32>
    %cst_5 = arith.constant 0.000000e+00 : f32
    %6 = vector.broadcast %cst_5 : f32 to vector<8x128xf32>
    %7 = arith.maximumf %5, %6 : vector<8x128xf32>
    %c0_6 = arith.constant 0 : index
    %c0_7 = arith.constant 0 : index
    %8 = vector.load %arg3[%c0_6, %c0_7] : memref<128x128xf32, #tpu.memory_space<vmem>>, vector<128x128xf32>
    %cst_8 = arith.constant dense<0.000000e+00> : vector<8x128xf32>
    %9 = tpu.matmul %7, %8, %cst_8 {dimension_numbers = #tpu.dot_dimension_numbers<[1], [0], [0], [1], [0, 0, 1, 1], [], []>} : vector<8x128xf32>, vector<128x128xf32>, vector<8x128xf32> -> vector<8x128xf32>
    %c1 = arith.constant 1 : index
    %c0_9 = arith.constant 0 : index
    %10 = vector.load %arg6[%c1, %c0_9] : memref<4x128xf32, #tpu.memory_space<vmem>>, vector<1x128xf32>
    %11 = vector.broadcast %10 : vector<1x128xf32> to vector<8x128xf32>
    %12 = arith.addf %9, %11 : vector<8x128xf32>
    %cst_10 = arith.constant 0.000000e+00 : f32
    %13 = vector.broadcast %cst_10 : f32 to vector<8x128xf32>
    %14 = arith.maximumf %12, %13 : vector<8x128xf32>
    %c0_11 = arith.constant 0 : index
    %c0_12 = arith.constant 0 : index
    %15 = vector.load %arg4[%c0_11, %c0_12] : memref<128x128xf32, #tpu.memory_space<vmem>>, vector<128x128xf32>
    %cst_13 = arith.constant dense<0.000000e+00> : vector<8x128xf32>
    %16 = tpu.matmul %14, %15, %cst_13 {dimension_numbers = #tpu.dot_dimension_numbers<[1], [0], [0], [1], [0, 0, 1, 1], [], []>} : vector<8x128xf32>, vector<128x128xf32>, vector<8x128xf32> -> vector<8x128xf32>
    %c2 = arith.constant 2 : index
    %c0_14 = arith.constant 0 : index
    %17 = vector.load %arg6[%c2, %c0_14] : memref<4x128xf32, #tpu.memory_space<vmem>>, vector<1x128xf32>
    %18 = vector.broadcast %17 : vector<1x128xf32> to vector<8x128xf32>
    %19 = arith.addf %16, %18 : vector<8x128xf32>
    %cst_15 = arith.constant 0.000000e+00 : f32
    %20 = vector.broadcast %cst_15 : f32 to vector<8x128xf32>
    %21 = arith.maximumf %19, %20 : vector<8x128xf32>
    %c0_16 = arith.constant 0 : index
    %c0_17 = arith.constant 0 : index
    %22 = vector.load %arg5[%c0_16, %c0_17] : memref<128x128xf32, #tpu.memory_space<vmem>>, vector<128x128xf32>
    %cst_18 = arith.constant dense<0.000000e+00> : vector<8x128xf32>
    %23 = tpu.matmul %21, %22, %cst_18 {dimension_numbers = #tpu.dot_dimension_numbers<[1], [0], [0], [1], [0, 0, 1, 1], [], []>} : vector<8x128xf32>, vector<128x128xf32>, vector<8x128xf32> -> vector<8x128xf32>
    %c3 = arith.constant 3 : index
    %c0_19 = arith.constant 0 : index
    %24 = vector.load %arg6[%c3, %c0_19] : memref<4x128xf32, #tpu.memory_space<vmem>>, vector<1x128xf32>
    %25 = vector.broadcast %24 : vector<1x128xf32> to vector<8x128xf32>
    %26 = arith.addf %23, %25 : vector<8x128xf32>
    %27 = math.tanh %26 : vector<8x128xf32>
    %c0_20 = arith.constant 0 : index
    %c0_21 = arith.constant 0 : index
    %28 = vector.load %arg7[%c0_20, %c0_21] : memref<8x128xf32, #tpu.memory_space<vmem>>, vector<8x128xf32>
    tpu.vector_store %arg7[%c0_20, %c0_21], %27 {strides = array<i32>} : memref<8x128xf32, #tpu.memory_space<vmem>>, vector<8x128xf32>,
    return
  }
  func.func @transform_0(%arg0: i32) -> (i32, i32) {
    %c0_i32 = arith.constant 0 : i32
    %c0_i32_0 = arith.constant 0 : i32
    return %arg0, %c0_i32 : i32, i32
  }
  func.func @transform_1(%arg0: i32) -> (i32, i32) {
    %c0_i32 = arith.constant 0 : i32
    %c0_i32_0 = arith.constant 0 : i32
    %c0_i32_1 = arith.constant 0 : i32
    return %c0_i32, %c0_i32_0 : i32, i32
  }
  func.func @transform_2(%arg0: i32) -> (i32, i32) {
    %c0_i32 = arith.constant 0 : i32
    %c0_i32_0 = arith.constant 0 : i32
    %c0_i32_1 = arith.constant 0 : i32
    return %c0_i32, %c0_i32_0 : i32, i32
  }
  func.func @transform_3(%arg0: i32) -> (i32, i32) {
    %c0_i32 = arith.constant 0 : i32
    %c0_i32_0 = arith.constant 0 : i32
    %c0_i32_1 = arith.constant 0 : i32
    return %c0_i32, %c0_i32_0 : i32, i32
  }
  func.func @transform_4(%arg0: i32) -> (i32, i32) {
    %c0_i32 = arith.constant 0 : i32
    %c0_i32_0 = arith.constant 0 : i32
    %c0_i32_1 = arith.constant 0 : i32
    return %c0_i32, %c0_i32_0 : i32, i32
  }
  func.func @transform_5(%arg0: i32) -> (i32, i32) {
    %c0_i32 = arith.constant 0 : i32
    %c0_i32_0 = arith.constant 0 : i32
    %c0_i32_1 = arith.constant 0 : i32
    return %c0_i32, %c0_i32_0 : i32, i32
  }
  func.func @transform_6(%arg0: i32) -> (i32, i32) {
    %c0_i32 = arith.constant 0 : i32
    %c0_i32_0 = arith.constant 0 : i32
    return %arg0, %c0_i32 : i32, i32
  }
}

</mosaic_0001>

<bundles_post_ra>
// kernel: tpu_custom_call.1
= control target key start
LH: loop header
LB: loop body
LE: loop exit
PB: predicated region body
PF: predicated region fallthrough
CT: control target
= control target key end

     0   :  { %11 = vsyncpa [#allocation3], 0  ;;  %s1120_s0 = inlined_call_operand.hbm [shape: f32[8,128], index: 0, kind: input, shape index: {}]   ;;  %s1121_s1 = inlined_call_operand.hbm [shape: f32[128,128], index: 1, kind: input, shape index: {}]   ;;  %s1122_s2 = inlined_call_operand.hbm [shape: f32[128,128], index: 2, kind: input, shape index: {}]   ;;  %s1123_s3 = inlined_call_operand.hbm [shape: f32[128,128], index: 3, kind: input, shape index: {}]   ;;  %s1124_s4 = inlined_call_operand.hbm [shape: f32[128,128], index: 4, kind: input, shape index: {}]   ;;  %s1125_s5 = inlined_call_operand.vmem [shape: f32[4,128], index: 5, kind: input, shape index: {}]   ;;  %s1126_s6 = inlined_call_operand.hbm [shape: f32[8,128], index: 6, kind: output, shape index: {}]  }
   0x1   :  { %12 = vsyncpa [#allocation6], 0 }
   0x2   :  { %13 = vsyncpa [#allocation9], 0 }
   0x3   :  { %14 = vsyncpa [#allocation4], 0  ;;  %s938_s21 = smov [#allocation5]   ;;  %s798_s25 = scalar_lea.hbm %s1121_s1, 2048 }
   0x4   :  { %s30_s22 = sshll.u32 %s938_s21, 4  ;;  %p799_p0 = scmp.ne.s32.totalorder %s1121_s1, %s798_s25  ;;  %s31_s22 = int_to_ptr.vmem [resolvable:$true] %s30_s22 }
   0x5   :  { %p802_p1 = scmp.lt.u32.totalorder %s798_s25, %s1121_s1 }
   0x7   :  { %p804_p2 = pnand %p802_p1, %p799_p0 }
   0x9   :  { %807 = shalt.err (!%p804_p2)
}
   0xa   :  { %s808_s30 = scalar_lea.vmem %s31_s22, 2048  ;;  %p813_p4 = scmp.lt.s32.totalorder %s31_s22, %s31_s22 }
   0xb   :  { %p809_p3 = scmp.ne.s32.totalorder %s31_s22, %s808_s30  ;;  %p814_p5 = scmp.lt.s32.totalorder %s808_s30, %s808_s30 }
   0xd   :  { %p815_p6 = por %p814_p5, %p813_p4 }
   0xf   :  { %p816_p7 = pnand %p815_p6, %p809_p3 }
  0x11   :  { %819 = shalt.err (!%p816_p7)
}
  0x12   :  { %s939_s7 = smov 128   ;;  %s940_s8 = smov 8  }
  0x13   :  { %36 = dma.hbm_to_vmem [thread:$0]  %s1121_s1, 2048, %s31_s22, [#allocation6], %s939_s7, %s939_s7, %s940_s8  }
  0x14   :  { %s941_s11 = smov [#allocation8]   ;;  %s942_s13 = smov [#allocation2]  }
  0x15   :  { %s54_s12 = sshll.u32 %s941_s11, 4  ;;  %s21_s14 = sshll.u32 %s942_s13, 4  ;;  %s55_s12 = int_to_ptr.vmem [resolvable:$true] %s54_s12  ;;  %s22_s14 = int_to_ptr.vmem [resolvable:$true] %s21_s14 }
  0x16   :  { %s820_s17 = scalar_lea.hbm %s1123_s3, 2048 }
  0x17   :  { %p821_p8 = scmp.ne.s32.totalorder %s1123_s3, %s820_s17  ;;  %p824_p9 = scmp.lt.u32.totalorder %s820_s17, %s1123_s3 }
  0x19   :  { %p826_p10 = pnand %p824_p9, %p821_p8 }
  0x1b   :  { %829 = shalt.err (!%p826_p10)
}
  0x1c   :  { %s830_s1 = scalar_lea.vmem %s55_s12, 2048  ;;  %p835_p12 = scmp.lt.s32.totalorder %s55_s12, %s55_s12 }
  0x1d   :  { %p831_p11 = scmp.ne.s32.totalorder %s55_s12, %s830_s1  ;;  %p836_p13 = scmp.lt.s32.totalorder %s830_s1, %s830_s1 }
  0x1f   :  { %p837_p0 = por %p836_p13, %p835_p12 }
  0x21   :  { %p838_p1 = pnand %p837_p0, %p831_p11 }
  0x23   :  { %841 = shalt.err (!%p838_p1)
}
  0x24   :  { %60 = dma.hbm_to_vmem [thread:$0]  %s1123_s3, 2048, %s55_s12, [#allocation9], %s939_s7, %s939_s7, %s940_s8  }
  0x25   :  { %s842_s26 = scalar_lea.hbm %s1120_s0, 128 }
  0x26   :  { %p843_p2 = scmp.ne.s32.totalorder %s1120_s0, %s842_s26  ;;  %p846_p3 = scmp.lt.u32.totalorder %s842_s26, %s1120_s0 }
  0x28   :  { %p848_p4 = pnand %p846_p3, %p843_p2 }
  0x2a   :  { %851 = shalt.err (!%p848_p4)
}
  0x2b   :  { %s852_s9 = scalar_lea.vmem %s22_s14, 128  ;;  %p857_p6 = scmp.lt.s32.totalorder %s22_s14, %s22_s14 }
  0x2c   :  { %p853_p5 = scmp.ne.s32.totalorder %s22_s14, %s852_s9  ;;  %p858_p7 = scmp.lt.s32.totalorder %s852_s9, %s852_s9 }
  0x2e   :  { %p859_p8 = por %p858_p7, %p857_p6 }
  0x30   :  { %p860_p9 = pnand %p859_p8, %p853_p5 }
  0x32   :  { %863 = shalt.err (!%p860_p9)
}
  0x33   :  { %24 = dma.hbm_to_vmem [thread:$0]  %s1120_s0, 128, %s22_s14, [#allocation3]  }
  0x34   :  { %s943_s11 = smov [#allocation7]   ;;  %s944_s13 = smov [#allocation10]  }
  0x35   :  { %s42_s12 = sshll.u32 %s943_s11, 4  ;;  %s66_s15 = sshll.u32 %s944_s13, 4  ;;  %s43_s12 = int_to_ptr.vmem [resolvable:$true] %s42_s12  ;;  %s67_s15 = int_to_ptr.vmem [resolvable:$true] %s66_s15 }
  0x36   :  { %s864_s18 = scalar_lea.hbm %s1122_s2, 2048 }
  0x37   :  { %p865_p10 = scmp.ne.s32.totalorder %s1122_s2, %s864_s18  ;;  %p868_p11 = scmp.lt.u32.totalorder %s864_s18, %s1122_s2 }
  0x39   :  { %p870_p12 = pnand %p868_p11, %p865_p10 }
  0x3b   :  { %873 = shalt.err (!%p870_p12)
}
  0x3c   :  { %s874_s0 = scalar_lea.vmem %s43_s12, 2048  ;;  %p879_p0 = scmp.lt.s32.totalorder %s43_s12, %s43_s12 }
  0x3d   :  { %p875_p13 = scmp.ne.s32.totalorder %s43_s12, %s874_s0  ;;  %p880_p1 = scmp.lt.s32.totalorder %s874_s0, %s874_s0 }
  0x3f   :  { %p881_p2 = por %p880_p1, %p879_p0 }
  0x41   :  { %p882_p3 = pnand %p881_p2, %p875_p13 }
  0x43   :  { %885 = shalt.err (!%p882_p3)
}
  0x44   :  { %48 = dma.hbm_to_vmem [thread:$0]  %s1122_s2, 2048, %s43_s12, [#allocation6], %s939_s7, %s939_s7, %s940_s8  }
  0x45   :  { %s886_s25 = scalar_lea.hbm %s1124_s4, 2048 }
  0x46   :  { %p887_p4 = scmp.ne.s32.totalorder %s1124_s4, %s886_s25  ;;  %p890_p5 = scmp.lt.u32.totalorder %s886_s25, %s1124_s4 }
  0x48   :  { %p892_p6 = pnand %p890_p5, %p887_p4 }
  0x4a   :  { %895 = shalt.err (!%p892_p6)
}
  0x4b   :  { %s896_s30 = scalar_lea.vmem %s67_s15, 2048  ;;  %p901_p8 = scmp.lt.s32.totalorder %s67_s15, %s67_s15 }
  0x4c   :  { %p897_p7 = scmp.ne.s32.totalorder %s67_s15, %s896_s30  ;;  %p902_p9 = scmp.lt.s32.totalorder %s896_s30, %s896_s30 }
  0x4e   :  { %p903_p10 = por %p902_p9, %p901_p8 }
  0x50   :  { %p904_p11 = pnand %p903_p10, %p897_p7 }
  0x52   :  { %907 = shalt.err (!%p904_p11)
}
  0x53   :  { %72 = dma.hbm_to_vmem [thread:$0]  %s1124_s4, 2048, %s67_s15, [#allocation9], %s939_s7, %s939_s7, %s940_s8  }
  0x54   :  { %930 = dma.done.wait [#allocation3], 128  }
  0x55   :  { %931 = vsyncadd [#allocation3], 4294967168 }
  0x56   :  { %932 = dma.done.wait [#allocation6], 4096  }
  0x57   :  { %933 = vsyncadd [#allocation6], 4294963200 }
  0x58   :  { %934 = dma.done.wait [#allocation9], 4096  }
  0x59   :  { %935 = vsyncadd [#allocation9], 4294963200  ;;  %v945_v0 = vmov 0.0|0.0   ;;  %vm946_vm0 = vmmov 0   ;;  %v947_v1 = vmov 0.0   ;;  %v91_v2 = vld [vmem:[#allocation5] sm:$0xff] }
  0x5a   :  { %689 = vmatprep.subr.bf16.mxu0 %v945_v0  ;;  %581 = vmatprep.mubr.msk.f32.mxu0 %vm946_vm0, %v947_v1  ;;  %v92_v3 = vld [vmem:[#allocation5 + $0x8] sm:$0xff]  ;;  %v93_v4 = vld [vmem:[#allocation5 + $0x10] sm:$0xff]  ;;  %v94_v6 = vld [vmem:[#allocation5 + $0x18] sm:$0xff]  ;;  %s948_s15 = smov [#allocation11]  }
  0x5b   :  { %713 = vmatprep.subr.bf16.mxu1 %v945_v0  ;;  %616 = vmatprep.mubr.msk.f32.mxu1 %vm946_vm0, %v947_v1  ;;  %v690_v5 = vpack.c.bf16 %v92_v3, %v91_v2  ;;  %v693_v7 = vpack.c.bf16 %v94_v6, %v93_v4  ;;  %v95_v8 = vld [vmem:[#allocation5 + $0x20] sm:$0xff]  ;;  %v96_v9 = vld [vmem:[#allocation5 + $0x28] sm:$0xff]  ;;  %v185_v12 = vld [vmem:[#allocation7 + $0x10] sm:$0xff]  ;;  %s466_s16 = sshll.u32 %s948_s15, 4  ;;  %s467_s16 = int_to_ptr.vmem [resolvable:$true] %s466_s16 }
  0x5c   :  { %v183_v10 = vld [vmem:[#allocation7] sm:$0xff]  ;;  %v184_v11 = vld [vmem:[#allocation7 + $0x8] sm:$0xff]  ;;  %v186_v13 = vld [vmem:[#allocation7 + $0x18] sm:$0xff]  ;;  %v696_v14 = vpack.c.bf16 %v96_v9, %v95_v8  ;;  %s908_s17 = scalar_lea.vmem %s467_s16, 128  ;;  %p913_p13 = scmp.lt.s32.totalorder %s467_s16, %s467_s16 }
  0x5d   :  { %691 = vmatpush3.bf16.msra.mxu0 %v690_v5  ;;  %v714_v15 = vpack.c.bf16 %v184_v11, %v183_v10  ;;  %v97_v16 = vld [vmem:[#allocation5 + $0x30] sm:$0xff]  ;;  %v98_v17 = vld [vmem:[#allocation5 + $0x38] sm:$0xff]  ;;  %v717_v18 = vpack.c.bf16 %v186_v13, %v185_v12  ;;  %v187_v19 = vld [vmem:[#allocation7 + $0x20] sm:$0xff]  ;;  %p909_p12 = scmp.ne.s32.totalorder %s467_s16, %s908_s17  ;;  %p914_p0 = scmp.lt.s32.totalorder %s908_s17, %s908_s17 }
  0x5e   :  { %692 = vmatprep.subr.bf16.mxu0 %v945_v0  ;;  %v188_v20 = vld [vmem:[#allocation7 + $0x28] sm:$0xff]  ;;  %v699_v21 = vpack.c.bf16 %v98_v17, %v97_v16  ;;  %v99_v22 = vld [vmem:[#allocation5 + $0x40] sm:$0xff]  ;;  %v189_v25 = vld [vmem:[#allocation7 + $0x30] sm:$0xff] }
  0x5f   :  { %715 = vmatpush3.bf16.msra.mxu1 %v714_v15  ;;  %v100_v23 = vld [vmem:[#allocation5 + $0x48] sm:$0xff]  ;;  %v720_v24 = vpack.c.bf16 %v188_v20, %v187_v19  ;;  %v190_v26 = vld [vmem:[#allocation7 + $0x38] sm:$0xff]  ;;  %v101_v28 = vld [vmem:[#allocation5 + $0x50] sm:$0xff]  ;;  %p915_p1 = por %p914_p0, %p913_p13 }
  0x60   :  { %716 = vmatprep.subr.bf16.mxu1 %v945_v0  ;;  %v702_v27 = vpack.c.bf16 %v100_v23, %v99_v22  ;;  %v102_v29 = vld [vmem:[#allocation5 + $0x58] sm:$0xff]  ;;  %v723_v30 = vpack.c.bf16 %v190_v26, %v189_v25  ;;  %v191_v31 = vld [vmem:[#allocation7 + $0x40] sm:$0xff]  ;;  %v192_v32 = vld [vmem:[#allocation7 + $0x48] sm:$0xff] }
  0x61   :  { %694 = vmatpush3.bf16.msra.mxu0 %v693_v7  ;;  %v705_v33 = vpack.c.bf16 %v102_v29, %v101_v28  ;;  %v103_v34 = vld [vmem:[#allocation5 + $0x60] sm:$0xff]  ;;  %v104_v35 = vld [vmem:[#allocation5 + $0x68] sm:$0xff]  ;;  %v726_v36 = vpack.c.bf16 %v192_v32, %v191_v31  ;;  %v193_v37 = vld [vmem:[#allocation7 + $0x50] sm:$0xff]  ;;  %p916_p2 = pnand %p915_p1, %p909_p12 }
  0x62   :  { %695 = vmatprep.subr.bf16.mxu0 %v945_v0  ;;  %v194_v38 = vld [vmem:[#allocation7 + $0x58] sm:$0xff]  ;;  %v708_v39 = vpack.c.bf16 %v104_v35, %v103_v34  ;;  %v105_v40 = vld [vmem:[#allocation5 + $0x70] sm:$0xff]  ;;  %v195_v43 = vld [vmem:[#allocation7 + $0x60] sm:$0xff] }
  0x63   :  { %718 = vmatpush3.bf16.msra.mxu1 %v717_v18  ;;  %v106_v41 = vld [vmem:[#allocation5 + $0x78] sm:$0xff]  ;;  %v729_v42 = vpack.c.bf16 %v194_v38, %v193_v37  ;;  %v196_v44 = vld [vmem:[#allocation7 + $0x68] sm:$0xff]  ;;  %v197_v48 = vld [vmem:[#allocation7 + $0x70] sm:$0xff] }
  0x64   :  { %719 = vmatprep.subr.bf16.mxu1 %v945_v0  ;;  %v711_v45 = vpack.c.bf16 %v106_v41, %v105_v40  ;;  %v732_v46 = vpack.c.bf16 %v196_v44, %v195_v43  ;;  %v90_v47 = vld [vmem:[#allocation2] sm:$0xff]  ;;  %v275_v51 = vld [vmem:[#allocation8] sm:$0xff]  ;;  %v276_v52 = vld [vmem:[#allocation8 + $0x8] sm:$0xff] }
  0x65   :  { %697 = vmatpush3.bf16.msra.mxu0 %v696_v14  ;;  %v198_v49 = vld [vmem:[#allocation7 + $0x78] sm:$0xff]  ;;  %v277_v53 = vld [vmem:[#allocation8 + $0x10] sm:$0xff]  ;;  %v738_v54 = vpack.c.bf16 %v276_v52, %v275_v51  ;;  %v279_v57 = vld [vmem:[#allocation8 + $0x20] sm:$0xff] }
  0x66   :  { %698 = vmatprep.subr.bf16.mxu0 %v945_v0  ;;  %v735_v50 = vpack.c.bf16 %v198_v49, %v197_v48  ;;  %v278_v55 = vld [vmem:[#allocation8 + $0x18] sm:$0xff]  ;;  %v280_v58 = vld [vmem:[#allocation8 + $0x28] sm:$0xff]  ;;  %v281_v60 = vld [vmem:[#allocation8 + $0x30] sm:$0xff] }
  0x67   :  { %721 = vmatpush3.bf16.msra.mxu1 %v720_v24  ;;  %v741_v56 = vpack.c.bf16 %v278_v55, %v277_v53  ;;  %v744_v59 = vpack.c.bf16 %v280_v58, %v279_v57  ;;  %v282_v61 = vld [vmem:[#allocation8 + $0x38] sm:$0xff]  ;;  %v283_v63 = vld [vmem:[#allocation8 + $0x40] sm:$0xff]  ;;  %v284_v2 = vld [vmem:[#allocation8 + $0x48] sm:$0xff] }
  0x68   :  { %722 = vmatprep.subr.bf16.mxu1 %v945_v0  ;;  %v747_v62 = vpack.c.bf16 %v282_v61, %v281_v60  ;;  %v750_v3 = vpack.c.bf16 %v284_v2, %v283_v63  ;;  %v285_v4 = vld [vmem:[#allocation8 + $0x50] sm:$0xff]  ;;  %v286_v5 = vld [vmem:[#allocation8 + $0x58] sm:$0xff]  ;;  %v287_v7 = vld [vmem:[#allocation8 + $0x60] sm:$0xff] }
  0x69   :  { %700 = vmatpush3.bf16.msra.mxu0 %v699_v21  ;;  %v753_v6 = vpack.c.bf16 %v286_v5, %v285_v4  ;;  %v288_v8 = vld [vmem:[#allocation8 + $0x68] sm:$0xff]  ;;  %v477_v10 = vld [vmem:[%s1125_s5] ss:$0 sm:$0xff]  ;;  %v289_v15 = vld [vmem:[#allocation8 + $0x70] sm:$0xff] }
  0x6a   :  { %701 = vmatprep.subr.bf16.mxu0 %v945_v0  ;;  %v756_v9 = vpack.c.bf16 %v288_v8, %v287_v7  ;;  %v290_v16 = vld [vmem:[#allocation8 + $0x78] sm:$0xff]  ;;  %v367_v18 = vld [vmem:[#allocation10] sm:$0xff]  ;;  %v368_v19 = vld [vmem:[#allocation10 + $0x8] sm:$0xff] }
  0x6b   :  { %724 = vmatpush3.bf16.msra.mxu1 %v723_v30  ;;  %v759_v17 = vpack.c.bf16 %v290_v16, %v289_v15  ;;  %v369_v20 = vld [vmem:[#allocation10 + $0x10] sm:$0xff]  ;;  %v762_v21 = vpack.c.bf16 %v368_v19, %v367_v18  ;;  %v370_v22 = vld [vmem:[#allocation10 + $0x18] sm:$0xff]  ;;  %v371_v24 = vld [vmem:[#allocation10 + $0x20] sm:$0xff] }
  0x6c   :  { %725 = vmatprep.subr.bf16.mxu1 %v945_v0  ;;  %v765_v23 = vpack.c.bf16 %v370_v22, %v369_v20  ;;  %v372_v25 = vld [vmem:[#allocation10 + $0x28] sm:$0xff]  ;;  %v375_v29 = vld [vmem:[#allocation10 + $0x40] sm:$0xff]  ;;  %v377_v32 = vld [vmem:[#allocation10 + $0x50] sm:$0xff] }
  0x6d   :  { %703 = vmatpush3.bf16.msra.mxu0 %v702_v27  ;;  %v768_v26 = vpack.c.bf16 %v372_v25, %v371_v24  ;;  %v374_v27 = vld [vmem:[#allocation10 + $0x38] sm:$0xff]  ;;  %v376_v30 = vld [vmem:[#allocation10 + $0x48] sm:$0xff]  ;;  %v379_v35 = vld [vmem:[#allocation10 + $0x60] sm:$0xff] }
  0x6e   :  { %704 = vmatprep.subr.bf16.mxu0 %v945_v0  ;;  %v774_v31 = vpack.c.bf16 %v376_v30, %v375_v29  ;;  %v478_v38 = vld [vmem:[%s1125_s5 + $0x1] ss:$0 sm:$0xff]  ;;  %v381_v43 = vld [vmem:[#allocation10 + $0x70] sm:$0xff] }
  0x6f   :  { %727 = vmatpush3.bf16.msra.mxu1 %v726_v36  ;;  %v380_v36 = vld [vmem:[#allocation10 + $0x68] sm:$0xff]  ;;  %v382_v44 = vld [vmem:[#allocation10 + $0x78] sm:$0xff] }
  0x70   :  { %728 = vmatprep.subr.bf16.mxu1 %v945_v0  ;;  %v780_v37 = vpack.c.bf16 %v380_v36, %v379_v35 }
  0x71   :  { %706 = vmatpush3.bf16.msra.mxu0 %v705_v33  ;;  %v378_v33 = vld [vmem:[#allocation10 + $0x58] sm:$0xff] }
  0x72   :  { %707 = vmatprep.subr.bf16.mxu0 %v945_v0  ;;  %v777_v34 = vpack.c.bf16 %v378_v33, %v377_v32 }
  0x73   :  { %730 = vmatpush3.bf16.msra.mxu1 %v729_v42 }
  0x74   :  { %731 = vmatprep.subr.bf16.mxu1 %v945_v0 }
  0x75   :  { %709 = vmatpush3.bf16.msra.mxu0 %v708_v39 }
  0x76   :  { %710 = vmatprep.subr.bf16.mxu0 %v945_v0 }
  0x77   :  { %733 = vmatpush3.bf16.msra.mxu1 %v732_v46  ;;  %v479_v46 = vld [vmem:[%s1125_s5 + $0x2] ss:$0 sm:$0xff] }
  0x78   :  { %734 = vmatprep.subr.bf16.mxu1 %v945_v0 }
  0x79   :  { %712 = vmatpush3.bf16.msra.mxu0 %v711_v45  ;;  %v783_v45 = vpack.c.bf16 %v382_v44, %v381_v43 }
  0x7a   :  { %737 = vmatprep.subr.bf16.mxu0 %v945_v0 }
  0x7b   :  { %736 = vmatpush3.bf16.msra.mxu1 %v735_v50  ;;  %v480_v50 = vld [vmem:[%s1125_s5 + $0x3] ss:$0 sm:$0xff] }
  0x7c   :  { %582 = vmatmul.mubr.f32.vlgmr.msra.gmra.mrb[0].mxu0 %v90_v47  ;;  %761 = vmatprep.subr.bf16.mxu1 %v945_v0 }
  0x7d   :  { %651 = vmatprep.mubr.msk.f32.mxu0 %vm946_vm0, %v947_v1  ;;  %739 = vmatpush3.bf16.msra.mxu0 %v738_v54 }
  0x7e   :  { %740 = vmatprep.subr.bf16.mxu0 %v945_v0 }
  0x81   :  { %742 = vmatpush3.bf16.msra.mxu0 %v741_v56 }
  0x82   :  { %743 = vmatprep.subr.bf16.mxu0 %v945_v0 }
  0x85   :  { %745 = vmatpush3.bf16.msra.mxu0 %v744_v59 }
  0x86   :  { %746 = vmatprep.subr.bf16.mxu0 %v945_v0 }
  0x89   :  { %748 = vmatpush3.bf16.msra.mxu0 %v747_v62 }
  0x8a   :  { %749 = vmatprep.subr.bf16.mxu0 %v945_v0 }
  0x8d   :  { %751 = vmatpush3.bf16.msra.mxu0 %v750_v3 }
  0x8e   :  { %752 = vmatprep.subr.bf16.mxu0 %v945_v0 }
  0x91   :  { %754 = vmatpush3.bf16.msra.mxu0 %v753_v6 }
  0x92   :  { %755 = vmatprep.subr.bf16.mxu0 %v945_v0 }
  0x95   :  { %757 = vmatpush3.bf16.msra.mxu0 %v756_v9 }
  0x96   :  { %758 = vmatprep.subr.bf16.mxu0 %v945_v0 }
  0x99   :  { %760 = vmatpush3.bf16.msra.mxu0 %v759_v17 }
 0x14f   :  { %v178_v11 = vpop.f32.mrb[0].mxu0 }
 0x150   :  { %v179_v12 = vadd.f32 %v477_v10, %v178_v11  ;;  %v583_v13 = vpop.f32.mrb[1].mxu0 }
 0x152   :  { %v182_v14 = vmax.f32 %v179_v12, 0.0 }
 0x154   :  { %617 = vmatmul.mubr.f32.vlgmr.msra.gmra.mrb[0].mxu1 %v182_v14 }
 0x155   :  { %686 = vmatprep.mubr.msk.f32.mxu1 %vm946_vm0, %v947_v1  ;;  %763 = vmatpush3.bf16.msra.mxu1 %v762_v21  ;;  %v373_v1 = vld [vmem:[#allocation10 + $0x30] sm:$0xff] }
 0x156   :  { %764 = vmatprep.subr.bf16.mxu1 %v945_v0  ;;  %v771_v28 = vpack.c.bf16 %v374_v27, %v373_v1 }
 0x159   :  { %766 = vmatpush3.bf16.msra.mxu1 %v765_v23 }
 0x15a   :  { %767 = vmatprep.subr.bf16.mxu1 %v945_v0 }
 0x15d   :  { %769 = vmatpush3.bf16.msra.mxu1 %v768_v26 }
 0x15e   :  { %770 = vmatprep.subr.bf16.mxu1 %v945_v0 }
 0x161   :  { %772 = vmatpush3.bf16.msra.mxu1 %v771_v28 }
 0x162   :  { %773 = vmatprep.subr.bf16.mxu1 %v945_v0 }
 0x165   :  { %775 = vmatpush3.bf16.msra.mxu1 %v774_v31 }
 0x166   :  { %776 = vmatprep.subr.bf16.mxu1 %v945_v0 }
 0x169   :  { %778 = vmatpush3.bf16.msra.mxu1 %v777_v34 }
 0x16a   :  { %779 = vmatprep.subr.bf16.mxu1 %v945_v0 }
 0x16d   :  { %781 = vmatpush3.bf16.msra.mxu1 %v780_v37 }
 0x16e   :  { %782 = vmatprep.subr.bf16.mxu1 %v945_v0 }
 0x171   :  { %784 = vmatpush3.bf16.msra.mxu1 %v783_v45 }
 0x227   :  { %v270_v39 = vpop.f32.mrb[0].mxu1 }
 0x228   :  { %v271_v40 = vadd.f32 %v478_v38, %v270_v39  ;;  %v618_v41 = vpop.f32.mrb[1].mxu1 }
 0x22a   :  { %v274_v42 = vmax.f32 %v271_v40, 0.0 }
 0x22c   :  { %652 = vmatmul.mubr.f32.vlgmr.msra.gmra.mrb[2].mxu0 %v274_v42 }
 0x2ff   :  { %v362_v47 = vpop.f32.mrb[2].mxu0 }
 0x300   :  { %v363_v48 = vadd.f32 %v479_v46, %v362_v47  ;;  %v653_v0 = vpop.f32.mrb[3].mxu0 }
 0x302   :  { %v366_v49 = vmax.f32 %v363_v48, 0.0 }
 0x304   :  { %687 = vmatmul.mubr.f32.vlgmr.msra.gmra.mrb[2].mxu1 %v366_v49 }
 0x3d7   :  { %v454_v51 = vpop.f32.mrb[2].mxu1 }
 0x3d8   :  { %v455_v52 = vadd.f32 %v480_v50, %v454_v51  ;;  %v688_v53 = vpop.f32.mrb[3].mxu1 }
 0x3da   :  { %796 = vtanh.f32 %v455_v52 }
 0x3e4   :  { %v797_v54 = vpop.eup %796 }
 0x3e5   :  { %459 = vst [vmem:[#allocation11] sm:$0xff] %v797_v54 }
 0x3e6   :  { %919 = shalt.err (!%p916_p2)
}
 0x3e7   :  { %s920_s5 = scalar_lea.hbm %s1126_s6, 128 }
 0x3e8   :  { %p921_p3 = scmp.ne.s32.totalorder %s1126_s6, %s920_s5  ;;  %p924_p4 = scmp.lt.u32.totalorder %s920_s5, %s1126_s6 }
 0x3ea   :  { %p926_p5 = pnand %p924_p4, %p921_p3 }
 0x3ec   :  { %929 = shalt.err (!%p926_p5)
}
 0x3ed   :  { %469 = dma.vmem_to_hbm [thread:$0]  %s467_s16, 128, %s1126_s6, [#allocation4]  }
 0x3ee   :  { %936 = dma.done.wait [#allocation4], 128  }
 0x3ef   :  { %937 = vsyncadd [#allocation4], 4294967168 }
 0x3f0   :  { %473 = vsyncpa [#allocation3], 1 }
 0x3f1   :  { %474 = vsyncpa [#allocation6], 1 }
 0x3f2   :  { %475 = vsyncpa [#allocation9], 1 }
 0x3f3   :  { %476 = vsyncpa [#allocation4], 1 }

</bundles_post_ra>
